<compile_context>
chip_gen: v5e
topology: v5e:2x2
jax: 0.10.0
libtpu: 0.0.40
codegen_flags: <defaults>
</compile_context>

<pallas_src>
import functools

import jax
import jax.numpy as jnp
from jax.experimental import pallas as pl
from jax.experimental.pallas import tpu as pltpu

_LANE = 128      # lane width (last dim) of a vreg
_SUBLANE = 8     # sublane width (second-to-last dim) for f32


def _round_up(x, m):
    return (x + m - 1) // m * m


# ---------------------------------------------------------------------------
# Kernels
# ---------------------------------------------------------------------------

def _linear_kernel(x_ref, w_ref, b_ref, o_ref):
    # x_ref: (TM, F)  w_ref: (F, Cp)  b_ref: (1, Cp)  o_ref: (TM, Cp)
    acc = jnp.dot(x_ref[...], w_ref[...], preferred_element_type=jnp.float32)
    o_ref[...] = (acc + b_ref[...].astype(jnp.float32)).astype(o_ref.dtype)


def _linear_kernel_ktiled(x_ref, w_ref, b_ref, o_ref, acc_ref):
    # x_ref: (TM, TK)  w_ref: (TK, Cp)  b_ref: (1, Cp)  o_ref: (TM, Cp)
    # acc_ref: (TM, Cp) f32 scratch, resident across the K axis (pattern P3).
    k = pl.program_id(1)

    @pl.when(k == 0)
    def _():
        acc_ref[...] = jnp.zeros_like(acc_ref)

    acc_ref[...] += jnp.dot(x_ref[...], w_ref[...],
                            preferred_element_type=jnp.float32)

    @pl.when(k == pl.num_programs(1) - 1)
    def _():
        o_ref[...] = (acc_ref[...] + b_ref[...].astype(jnp.float32)
                      ).astype(o_ref.dtype)


# ---------------------------------------------------------------------------
# One-time parameter prep (do NOT call per forward)
# ---------------------------------------------------------------------------

def prepare_probe_params(weight, bias, param_dtype=None):
    """weight: (C, F) nn.Linear layout; bias: (C,).

    Returns (w_t, b2d, C):
      w_t: (F, Cp) transposed weight, class dim zero-padded to a multiple of 128.
           Optionally cast to `param_dtype` (e.g. bf16) for a bandwidth-bound stream.
      b2d: (1, Cp) padded bias kept in f32 (added after f32 accumulation).
    """
    C, F = weight.shape
    Cp = _round_up(C, _LANE)
    dt = weight.dtype if param_dtype is None else param_dtype
    w_t = jnp.zeros((F, Cp), dt).at[:, :C].set(weight.T.astype(dt))
    b2d = jnp.zeros((1, Cp), jnp.float32).at[0, :C].set(bias.astype(jnp.float32))
    return w_t, b2d, C


# ---------------------------------------------------------------------------
# Forward
# ---------------------------------------------------------------------------

@functools.partial(jax.jit, static_argnames=("num_classes", "tile_m"))
def linear_probe_forward(x, w_t, b2d, *, num_classes, tile_m=512):
    """y = x @ W.T + b with a batch-tiled Pallas TPU kernel.

    x:   (B, F)
    w_t: (F, Cp) pre-transposed, lane-padded weight (from prepare_probe_params)
    b2d: (1, Cp) lane-padded f32 bias
    returns (B, num_classes)
    """
    B, F = x.shape
    Cp = w_t.shape[1]
    x_itemsize = jnp.dtype(x.dtype).itemsize
    w_itemsize = jnp.dtype(w_t.dtype).itemsize

    # Batch tile: multiple of 8 sublanes, capped at tile_m rows per grid step.
    TM = min(tile_m, _round_up(B, _SUBLANE))
    grid_m = pl.cdiv(B, TM)   # partial last block is masked by Pallas (no pre-pad)

    # Decide whether the (F, Cp) weight can stay fully VMEM-resident or whether
    # we need a K (feature) grid axis with an f32 accumulator.
    weight_bytes = F * Cp * w_itemsize
    resident_weight_ceiling = 24 << 20   # TODO(synk): drop to ~12 MiB when targeting v5e
    tk = 0
    if weight_bytes > resident_weight_ceiling:
        for cand in (2048, 1024, 512, 256, 128):
            if F % cand == 0 and F // cand > 1:
                tk = cand
                break

    flops = 2 * B * F * Cp
    bytes_accessed = int(x_itemsize * B * F + w_itemsize * F * Cp
                         + 4 * Cp + x_itemsize * B * Cp)
    cost = pl.CostEstimate(flops=flops, transcendentals=0,
                           bytes_accessed=bytes_accessed)

    if tk == 0:
        # One-shot contraction: weight & bias resident in VMEM, single-buffered.
        vmem_bytes = (2 * TM * F * x_itemsize      # double-buffered x tiles
                      + F * Cp * w_itemsize        # single-buffered weight
                      + Cp * 4                     # bias
                      + 2 * TM * Cp * x_itemsize)  # double-buffered output tiles
        vmem_limit = min(max(int(vmem_bytes * 1.25) + (4 << 20), 16 << 20),
                         100 << 20)
        out = pl.pallas_call(
            _linear_kernel,
            out_shape=jax.ShapeDtypeStruct((B, Cp), x.dtype),
            grid=(grid_m,),
            in_specs=[
                pl.BlockSpec((TM, F), lambda i: (i, 0)),        # batch-tiled x
                pl.BlockSpec((F, Cp), lambda i: (0, 0),
                             pipeline_mode=pl.Buffered(1)),     # resident weight
                pl.BlockSpec((1, Cp), lambda i: (0, 0),
                             pipeline_mode=pl.Buffered(1)),     # resident bias
            ],
            out_specs=pl.BlockSpec((TM, Cp), lambda i: (i, 0)),
            compiler_params=pltpu.CompilerParams(
                dimension_semantics=("parallel",),
                vmem_limit_bytes=vmem_limit),
            cost_estimate=cost,
        )(x, w_t, b2d)
    else:
        # K-tiled path for large weights (keeps TM large within v7x's 64 MiB VMEM).
        grid_k = F // tk
        vmem_bytes = (2 * TM * tk * x_itemsize     # double-buffered x tiles
                      + 2 * tk * Cp * w_itemsize   # double-buffered weight tiles
                      + Cp * 4                     # bias
                      + 2 * TM * Cp * x_itemsize   # double-buffered output tiles
                      + TM * Cp * 4)               # f32 accumulator scratch
        vmem_limit = min(max(int(vmem_bytes * 1.25) + (4 << 20), 16 << 20),
                         100 << 20)
        out = pl.pallas_call(
            _linear_kernel_ktiled,
            out_shape=jax.ShapeDtypeStruct((B, Cp), x.dtype),
            grid=(grid_m, grid_k),
            in_specs=[
                pl.BlockSpec((TM, tk), lambda i, k: (i, k)),
                pl.BlockSpec((tk, Cp), lambda i, k: (k, 0)),
                pl.BlockSpec((1, Cp), lambda i, k: (0, 0),
                             pipeline_mode=pl.Buffered(1)),
            ],
            out_specs=pl.BlockSpec((TM, Cp), lambda i, k: (i, 0)),
            scratch_shapes=[pltpu.VMEM((TM, Cp), jnp.float32)],
            compiler_params=pltpu.CompilerParams(
                dimension_semantics=("parallel", "arbitrary"),
                vmem_limit_bytes=vmem_limit),
            cost_estimate=cost,
        )(x, w_t, b2d)

    # Strip lane padding back to the logical class count.  (If the consumer can
    # work on the padded (B, Cp) logits, skip this slice to save an XLA copy.)
    return out[:, :num_classes]


if __name__ == "__main__":
    # Small shapes consistent with the module: batch=8, num_features=32, num_classes=16
    batch, num_features, num_classes = 8, 32, 16

    key = jax.random.PRNGKey(0)
    kx, kw, kb = jax.random.split(key, 3)

    x = jax.random.normal(kx, (batch, num_features), dtype=jnp.float32)

    # Deterministic parameter init (mimics nn.Linear's uniform(-1/sqrt(F), 1/sqrt(F)))
    bound = 1.0 / jnp.sqrt(jnp.float32(num_features))
    weight = jax.random.uniform(
        kw, (num_classes, num_features), dtype=jnp.float32,
        minval=-bound, maxval=bound)
    bias = jax.random.uniform(
        kb, (num_classes,), dtype=jnp.float32, minval=-bound, maxval=bound)

    # One-time parameter prep (transpose + lane padding) — outside the forward.
    w_t, b2d, _ = prepare_probe_params(weight, bias)

    y = linear_probe_forward(x, w_t, b2d, num_classes=num_classes)
    y = jax.block_until_ready(y)

    # Correctness check against plain-JAX reference
    y_ref = x @ weight.T + bias
    assert y.shape == (batch, num_classes)
    assert jnp.allclose(y, y_ref, atol=1e-5, rtol=1e-5)

    print("KERNEL_OK")
</pallas_src>

<mosaic_0001>
module attributes {stable_mosaic.version = 11 : i64} {
  func.func @_linear_kernel(%arg0: i32, %arg1: memref<8x32xf32, #tpu.memory_space<vmem>>, %arg2: memref<32x128xf32, #tpu.memory_space<vmem>>, %arg3: memref<1x128xf32, #tpu.memory_space<vmem>>, %arg4: memref<8x128xf32, #tpu.memory_space<vmem>>) attributes {dimension_semantics = [#tpu.dimension_semantics<parallel>], iteration_bounds = array<i64: 1>, scalar_prefetch = 0 : i64, scratch_operands = 0 : i64, tpu.core_type = #tpu.core_type<tc>, window_params = [{transform_indices = @transform_0, window_bounds = array<i64: 8, 32>}, {pipeline_mode = #tpu.pipeline_mode<synchronous>, transform_indices = @transform_1, window_bounds = array<i64: 32, 128>}, {pipeline_mode = #tpu.pipeline_mode<synchronous>, transform_indices = @transform_2, window_bounds = array<i64: 1, 128>}, {transform_indices = @transform_3, window_bounds = array<i64: 8, 128>}]} {
    %c0 = arith.constant 0 : index
    %c0_0 = arith.constant 0 : index
    %0 = vector.load %arg1[%c0, %c0_0] : memref<8x32xf32, #tpu.memory_space<vmem>>, vector<8x32xf32>
    %c0_1 = arith.constant 0 : index
    %c0_2 = arith.constant 0 : index
    %1 = vector.load %arg2[%c0_1, %c0_2] : memref<32x128xf32, #tpu.memory_space<vmem>>, vector<32x128xf32>
    %cst = arith.constant dense<0.000000e+00> : vector<8x128xf32>
    %2 = tpu.matmul %0, %1, %cst {dimension_numbers = #tpu.dot_dimension_numbers<[1], [0], [0], [1], [0, 0, 1, 1], [], []>} : vector<8x32xf32>, vector<32x128xf32>, vector<8x128xf32> -> vector<8x128xf32>
    %c0_3 = arith.constant 0 : index
    %c0_4 = arith.constant 0 : index
    %3 = vector.load %arg3[%c0_3, %c0_4] : memref<1x128xf32, #tpu.memory_space<vmem>>, vector<1x128xf32>
    %4 = vector.broadcast %3 : vector<1x128xf32> to vector<8x128xf32>
    %5 = arith.addf %2, %4 : vector<8x128xf32>
    %c0_5 = arith.constant 0 : index
    %c0_6 = arith.constant 0 : index
    %6 = vector.load %arg4[%c0_5, %c0_6] : memref<8x128xf32, #tpu.memory_space<vmem>>, vector<8x128xf32>
    tpu.vector_store %arg4[%c0_5, %c0_6], %5 {strides = array<i32>} : memref<8x128xf32, #tpu.memory_space<vmem>>, vector<8x128xf32>,
    return
  }
  func.func @transform_0(%arg0: i32) -> (i32, i32) {
    %c0_i32 = arith.constant 0 : i32
    %c0_i32_0 = arith.constant 0 : i32
    return %arg0, %c0_i32 : i32, i32
  }
  func.func @transform_1(%arg0: i32) -> (i32, i32) {
    %c0_i32 = arith.constant 0 : i32
    %c0_i32_0 = arith.constant 0 : i32
    %c0_i32_1 = arith.constant 0 : i32
    return %c0_i32, %c0_i32_0 : i32, i32
  }
  func.func @transform_2(%arg0: i32) -> (i32, i32) {
    %c0_i32 = arith.constant 0 : i32
    %c0_i32_0 = arith.constant 0 : i32
    %c0_i32_1 = arith.constant 0 : i32
    return %c0_i32, %c0_i32_0 : i32, i32
  }
  func.func @transform_3(%arg0: i32) -> (i32, i32) {
    %c0_i32 = arith.constant 0 : i32
    %c0_i32_0 = arith.constant 0 : i32
    return %arg0, %c0_i32 : i32, i32
  }
}

</mosaic_0001>

<bundles_post_ra>
// kernel: linear_probe_forward.1
= control target key start
LH: loop header
LB: loop body
LE: loop exit
PB: predicated region body
PF: predicated region fallthrough
CT: control target
= control target key end

     0   :  { %8 = vsyncpa [#allocation3], 0  ;;  %s219_s0 = inlined_call_operand.hbm [shape: f32[8,32], index: 0, kind: input, shape index: {}]   ;;  %s220_s1 = inlined_call_operand.hbm [shape: f32[32,128], index: 1, kind: input, shape index: {}]   ;;  %s221_s2 = inlined_call_operand.vmem [shape: f32[1,128], index: 2, kind: input, shape index: {}]   ;;  %s222_s3 = inlined_call_operand.hbm [shape: f32[8,128], index: 3, kind: output, shape index: {}]  }
   0x1   :  { %9 = vsyncpa [#allocation6], 0 }
   0x2   :  { %10 = vsyncpa [#allocation4], 0  ;;  %s16_s14 = sshll.u32 %s219_s0, 4  ;;  %s182_s15 = smov [#allocation2]   ;;  %s17_s14 = int_to_ptr.hbm [resolvable:$true] %s16_s14 }
   0x3   :  { %s18_s16 = sshll.u32 %s182_s15, 4  ;;  %s26_s19 = sshll.u32 %s220_s1, 4  ;;  %s19_s16 = int_to_ptr.vmem [resolvable:$true] %s18_s16  ;;  %s27_s19 = int_to_ptr.hbm [resolvable:$true] %s26_s19 }
   0x4   :  { %21 = dma.hbm_to_vmem [thread:$0]  %s17_s14, 128, %s19_s16, [#allocation3]  }
   0x5   :  { %s183_s20 = smov [#allocation5]   ;;  %s184_s22 = smov 128  }
   0x6   :  { %s28_s21 = sshll.u32 %s183_s20, 4  ;;  %s185_s23 = smov 8   ;;  %s29_s21 = int_to_ptr.vmem [resolvable:$true] %s28_s21 }
   0x7   :  { %34 = dma.hbm_to_vmem [thread:$0]  %s27_s19, 512, %s29_s21, [#allocation6], %s184_s22, %s184_s22, %s185_s23  }
   0x8   :  { %176 = dma.done.wait [#allocation3], 128  }
   0x9   :  { %177 = vsyncadd [#allocation3], 4294967168 }
   0xa   :  { %178 = dma.done.wait [#allocation6], 512  }
   0xb   :  { %179 = vsyncadd [#allocation6], 4294966784  ;;  %v49_v0 = vld [vmem:[#allocation5 + $0x18] sm:$0xff]  ;;  %v48_v1 = vld [vmem:[#allocation5 + $0x10] sm:$0xff]  ;;  %vm54_vm0 = vcmask 261120   ;;  %s186_s24 = smov [#allocation7]  }
   0xc   :  { %70 = vmatpush.msra.mxu0 %v49_v0  ;;  %v47_v2 = vld [vmem:[#allocation5 + $0x8] sm:$0xff]  ;;  %v46_v3 = vld [vmem:[#allocation5] sm:$0xff]  ;;  %v45_v4 = vld [vmem:[#allocation2] sm:$0xff]  ;;  %s84_s25 = sshll.u32 %s186_s24, 4  ;;  %s86_s28 = sshll.u32 %s222_s3, 4  ;;  %s85_s25 = int_to_ptr.vmem [resolvable:$true] %s84_s25  ;;  %s87_s28 = int_to_ptr.hbm [resolvable:$true] %s86_s28 }
   0xd   :  { %v103_v5 = vld [vmem:[%s221_s2] ss:$0 sm:$0xff] }
   0xe   :  { %71 = vmatpush.msra.mxu0 %v48_v1 }
  0x10   :  { %72 = vmatpush.msra.mxu0 %v47_v2 }
  0x12   :  { %73 = vmatpush.msra.mxu0 %v46_v3 }
  0x13   :  { %97 = vmatmul.msk.f32.vlgmr.msra.gmra.mxu0 %vm54_vm0, %v45_v4 }
  0x90   :  { %v75_v6 = vpop.f32.mrf.mxu0 }
  0x91   :  { %v76_v7 = vadd.f32 %v103_v5, %v75_v6 }
  0x93   :  { %78 = vst [vmem:[#allocation7] sm:$0xff] %v76_v7 }
  0x94   :  { %89 = dma.vmem_to_hbm [thread:$0]  %s85_s25, 128, %s87_s28, [#allocation4]  }
  0x95   :  { %180 = dma.done.wait [#allocation4], 128  }
  0x96   :  { %181 = vsyncadd [#allocation4], 4294967168 }
  0x97   :  { %94 = vsyncpa [#allocation3], 1 }
  0x98   :  { %95 = vsyncpa [#allocation6], 1 }
  0x99   :  { %96 = vsyncpa [#allocation4], 1 }

</bundles_post_ra>
